<compile_context>
chip_gen: v6e
topology: v6e:2x2x1
jax: 0.10.0
libtpu: 0.0.40
codegen_flags: <defaults>
</compile_context>

<pallas_src>
import jax
import jax.numpy as jnp
from jax.experimental import pallas as pl
from jax.experimental.pallas import tpu as pltpu


def two_layer_net_kernel(x_ref, w1_ref, b1_ref, w2e_ref, b2_ref, o_ref):
    # ---- linear1 + ReLU (clamp(min=0)) ----
    h1 = jnp.dot(x_ref[...], w1_ref[...],
                 preferred_element_type=jnp.float32) + b1_ref[...]
    h_relu = jnp.maximum(h1, 0.0)                               # (N, H)

    # ---- linear2 on the folded weight (expand/flatten absorbed in W2_eff) ----
    y = jnp.dot(h_relu, w2e_ref[...],
                preferred_element_type=jnp.float32) + b2_ref[...]
    o_ref[...] = y.astype(o_ref.dtype)


def two_layer_net(x, w1_t, b1, w2_t, b2, h, w):
    """x:(N,D_in) w1_t:(D_in,H) b1:(1,H) w2_t:(H*h*w,D_out) b2:(1,D_out)."""
    N, d_in = x.shape
    H = w1_t.shape[1]
    Hhw, d_out = w2_t.shape
    hw = h * w

    # Correctness guards (see review): exact divisibility and the hard-coded
    # batch of 64 baked into the original .expand(64, H, h, w).
    assert Hhw == H * hw, f"w2_t rows ({Hhw}) must equal H*h*w ({H * hw})"
    assert N == 64, "original forward hard-codes .expand(64, ...); N must be 64"

    # Fold the unsqueeze/expand/view into W2:  W2_eff = E @ W2_t, where
    # E[c, c*hw + j] = 1. That is simply summing consecutive hw-row groups.
    w2_eff = w2_t.reshape(H, hw, d_out).sum(axis=1)             # (H, D_out)

    vmem = pl.BlockSpec(memory_space=pltpu.MemorySpace.VMEM)

    # Advisory cost estimate for XLA's scheduler (fused two-matmul chain).
    flops = 2 * N * d_in * H + 2 * N * H * d_out + 2 * N * H + N * d_out
    bytes_accessed = 4 * (x.size + w1_t.size + b1.size
                          + w2_eff.size + b2.size + N * d_out)
    cost = pl.CostEstimate(flops=flops, transcendentals=0,
                           bytes_accessed=bytes_accessed)

    return pl.pallas_call(
        two_layer_net_kernel,
        out_shape=jax.ShapeDtypeStruct((N, d_out), jnp.float32),
        in_specs=[vmem, vmem, vmem, vmem, vmem],
        out_specs=vmem,
        compiler_params=pltpu.CompilerParams(),
        cost_estimate=cost,
    )(x, w1_t, b1, w2_eff, b2)


if __name__ == "__main__":
    # Small shapes consistent with the module. N pinned to 64 by the
    # hard-coded .expand(64, H, h, w) in the original forward.
    N, D_in, H, D_out, h, w = 64, 16, 8, 8, 2, 2

    key = jax.random.PRNGKey(0)
    kx, k1w, k1b, k2w, k2b = jax.random.split(key, 5)

    x = jax.random.normal(kx, (N, D_in), dtype=jnp.float32)

    # Deterministic PyTorch-Linear-style init: U(-1/sqrt(fan_in), 1/sqrt(fan_in))
    bound1 = 1.0 / (D_in ** 0.5)
    w1 = jax.random.uniform(k1w, (H, D_in), jnp.float32, -bound1, bound1)
    b1 = jax.random.uniform(k1b, (H,), jnp.float32, -bound1, bound1)

    fan_in2 = H * h * w
    bound2 = 1.0 / (fan_in2 ** 0.5)
    w2 = jax.random.uniform(k2w, (D_out, fan_in2), jnp.float32, -bound2, bound2)
    b2 = jax.random.uniform(k2b, (D_out,), jnp.float32, -bound2, bound2)

    # Glue: transpose weights to (in, out); biases as (1, out) rows.
    w1_t = w1.T                      # (D_in, H)
    w2_t = w2.T                      # (H*h*w, D_out)
    b1_r = b1[None, :]               # (1, H)
    b2_r = b2[None, :]               # (1, D_out)

    y = two_layer_net(x, w1_t, b1_r, w2_t, b2_r, h, w)
    y = jax.block_until_ready(y)

    # Pure-JAX reference of the EXACT PyTorch forward (expand then flatten,
    # second matmul with the full, un-folded W2) to verify the fold is exact.
    h_relu_ref = jnp.maximum(x @ w1_t + b1_r, 0.0)                     # (N, H)
    h_exp_ref = jnp.broadcast_to(h_relu_ref[:, :, None, None],
                                 (64, H, h, w)).reshape(64, -1)        # (64, H*h*w)
    y_ref = h_exp_ref @ w2_t + b2_r                                    # (64, D_out)

    assert y.shape == (64, D_out)
    assert jnp.allclose(y, y_ref, atol=1e-5, rtol=1e-5), "mismatch vs reference"
    print("KERNEL_OK")
</pallas_src>

<mosaic_0001>
module attributes {stable_mosaic.version = 11 : i64} {
  func.func @two_layer_net_kernel(%arg0: memref<64x16xf32, #tpu.memory_space<vmem>>, %arg1: memref<16x8xf32, #tpu.memory_space<vmem>>, %arg2: memref<1x8xf32, #tpu.memory_space<vmem>>, %arg3: memref<8x8xf32, #tpu.memory_space<vmem>>, %arg4: memref<1x8xf32, #tpu.memory_space<vmem>>, %arg5: memref<64x8xf32, #tpu.memory_space<vmem>>) attributes {dimension_semantics = [], scalar_prefetch = 0 : i64, scratch_operands = 0 : i64, tpu.core_type = #tpu.core_type<tc>} {
    %c0 = arith.constant 0 : index
    %c0_0 = arith.constant 0 : index
    %0 = vector.load %arg0[%c0, %c0_0] : memref<64x16xf32, #tpu.memory_space<vmem>>, vector<64x16xf32>
    %c0_1 = arith.constant 0 : index
    %c0_2 = arith.constant 0 : index
    %1 = vector.load %arg1[%c0_1, %c0_2] : memref<16x8xf32, #tpu.memory_space<vmem>>, vector<16x8xf32>
    %cst = arith.constant dense<0.000000e+00> : vector<64x8xf32>
    %2 = tpu.matmul %0, %1, %cst {dimension_numbers = #tpu.dot_dimension_numbers<[1], [0], [0], [1], [0, 0, 1, 1], [], []>} : vector<64x16xf32>, vector<16x8xf32>, vector<64x8xf32> -> vector<64x8xf32>
    %c0_3 = arith.constant 0 : index
    %c0_4 = arith.constant 0 : index
    %3 = vector.load %arg2[%c0_3, %c0_4] : memref<1x8xf32, #tpu.memory_space<vmem>>, vector<1x8xf32>
    %4 = vector.broadcast %3 : vector<1x8xf32> to vector<64x8xf32>
    %5 = arith.addf %2, %4 : vector<64x8xf32>
    %cst_5 = arith.constant 0.000000e+00 : f32
    %6 = vector.broadcast %cst_5 : f32 to vector<64x8xf32>
    %7 = arith.maximumf %5, %6 : vector<64x8xf32>
    %c0_6 = arith.constant 0 : index
    %c0_7 = arith.constant 0 : index
    %8 = vector.load %arg3[%c0_6, %c0_7] : memref<8x8xf32, #tpu.memory_space<vmem>>, vector<8x8xf32>
    %cst_8 = arith.constant dense<0.000000e+00> : vector<64x8xf32>
    %9 = tpu.matmul %7, %8, %cst_8 {dimension_numbers = #tpu.dot_dimension_numbers<[1], [0], [0], [1], [0, 0, 1, 1], [], []>} : vector<64x8xf32>, vector<8x8xf32>, vector<64x8xf32> -> vector<64x8xf32>
    %c0_9 = arith.constant 0 : index
    %c0_10 = arith.constant 0 : index
    %10 = vector.load %arg4[%c0_9, %c0_10] : memref<1x8xf32, #tpu.memory_space<vmem>>, vector<1x8xf32>
    %11 = vector.broadcast %10 : vector<1x8xf32> to vector<64x8xf32>
    %12 = arith.addf %9, %11 : vector<64x8xf32>
    %c0_11 = arith.constant 0 : index
    %c0_12 = arith.constant 0 : index
    %13 = vector.load %arg5[%c0_11, %c0_12] : memref<64x8xf32, #tpu.memory_space<vmem>>, vector<64x8xf32>
    tpu.vector_store %arg5[%c0_11, %c0_12], %12 {strides = array<i32>} : memref<64x8xf32, #tpu.memory_space<vmem>>, vector<64x8xf32>,
    return
  }
}

</mosaic_0001>

<bundles_post_ra>
// kernel: tpu_custom_call.1
= control target key start
LH: loop header
LB: loop body
LE: loop exit
PB: predicated region body
PF: predicated region fallthrough
CT: control target
= control target key end

     0   :  { %vm37_vm0 = vcmask 130048   ;;  %vm183_vm1 = vcmask 64512   ;;  %s509_s1 = inlined_call_operand.vmem [shape: f32[16,8], index: 1, kind: input, shape index: {}]   ;;  %s510_s0 = inlined_call_operand.vmem [shape: f32[64,16], index: 0, kind: input, shape index: {}]   ;;  %s511_s3 = inlined_call_operand.vmem [shape: f32[8,8], index: 3, kind: input, shape index: {}]   ;;  %s512_s2 = inlined_call_operand.vmem [shape: f32[1,8], index: 2, kind: input, shape index: {}]   ;;  %s513_s4 = inlined_call_operand.vmem [shape: f32[1,8], index: 4, kind: input, shape index: {}]   ;;  %s514_s5 = inlined_call_operand.vmem [shape: f32[64,8], index: 5, kind: output, shape index: {}]  }
   0x1   :  { %v29_v0 = vld [vmem:[%s509_s1 + $0x8] sm:$0xff]  ;;  %v28_v1 = vld [vmem:[%s509_s1] sm:$0xff]  ;;  %v22_v4 = vld [vmem:[%s510_s0 + $0x10] sm:$0xff] }
   0x2   :  { %v20_v2 = vld [vmem:[%s510_s0] sm:$0xff]  ;;  %362 = vmatprep.subr.mxu0 %v29_v0  ;;  %v21_v3 = vld [vmem:[%s510_s0 + $0x8] sm:$0xff]  ;;  %v23_v5 = vld [vmem:[%s510_s0 + $0x18] sm:$0xff] }
   0x3   :  { %366 = vmatprep.mubr.msk.f32.mxu0 %vm37_vm0, %v20_v2  ;;  %363 = vmatpush3.msra.mxu0 %v29_v0  ;;  %v24_v6 = vld [vmem:[%s510_s0 + $0x20] sm:$0xff]  ;;  %v25_v7 = vld [vmem:[%s510_s0 + $0x28] sm:$0xff]  ;;  %v26_v8 = vld [vmem:[%s510_s0 + $0x30] sm:$0xff] }
   0x4   :  { %364 = vmatprep.subr.mxu0 %v28_v1  ;;  %v27_v9 = vld [vmem:[%s510_s0 + $0x38] sm:$0xff]  ;;  %v175_v10 = vld [vmem:[%s511_s3] sm:$0xff] }
   0x5   :  { %365 = vmatpush3.msra.mxu0 %v28_v1  ;;  %378 = vmatprep.subr.mxu1 %v175_v10  ;;  %v325_v11 = vld [vmem:[%s512_s2] ss:$0 sm:$0xff] }
   0x6   :  { %367 = vmatmul.mubr.msk.f32.vlgmr.msra.gmra.mxu0 %vm37_vm0, %v21_v3  ;;  %379 = vmatpush3.msra.mxu1 %v175_v10  ;;  %v334_v36 = vld [vmem:[%s513_s4] ss:$0 sm:$0xff] }
   0x7   :  { %369 = vmatprep.mubr.msk.f32.mxu0 %vm37_vm0, %v22_v4 }
   0xa   :  { %370 = vmatmul.mubr.msk.f32.gmra.mxu0 %vm37_vm0, %v23_v5 }
   0xb   :  { %372 = vmatprep.mubr.msk.f32.mxu0 %vm37_vm0, %v24_v6 }
   0xe   :  { %373 = vmatmul.mubr.msk.f32.gmra.mxu0 %vm37_vm0, %v25_v7 }
   0xf   :  { %375 = vmatprep.mubr.msk.f32.mxu0 %vm37_vm0, %v26_v8 }
  0x12   :  { %376 = vmatmul.mubr.msk.f32.gmra.mxu0 %vm37_vm0, %v27_v9 }
  0xc6   :  { %v368_v12 = vpop.f32.mrf.mxu0 }
  0xc7   :  { %v134_v13 = vadd.f32 %v368_v12, %v325_v11 }
  0xc8   :  { %v128_v14 = vpop.f32.mrf.mxu0 }
  0xc9   :  { %v129_v15 = vadd.f32 %v325_v11, %v128_v14  ;;  %v168_v18 = vmax.f32 %v134_v13, 0.0 }
  0xca   :  { %v371_v16 = vpop.f32.mrf.mxu0 }
  0xcb   :  { %v167_v17 = vmax.f32 %v129_v15, 0.0  ;;  %v144_v19 = vadd.f32 %v371_v16, %v325_v11 }
  0xcc   :  { %v138_v20 = vpop.f32.mrf.mxu0 }
  0xcd   :  { %v139_v21 = vadd.f32 %v325_v11, %v138_v20  ;;  %380 = vmatprep.mubr.msk.f32.mxu1 %vm183_vm1, %v167_v17  ;;  %v170_v24 = vmax.f32 %v144_v19, 0.0 }
  0xce   :  { %v374_v22 = vpop.f32.mrf.mxu0  ;;  %381 = vmatmul.mubr.msk.f32.vlgmr.msra.gmra.mxu1 %vm183_vm1, %v168_v18 }
  0xcf   :  { %v169_v23 = vmax.f32 %v139_v21, 0.0  ;;  %v154_v25 = vadd.f32 %v374_v22, %v325_v11 }
  0xd0   :  { %v148_v26 = vpop.f32.mrf.mxu0 }
  0xd1   :  { %v149_v27 = vadd.f32 %v325_v11, %v148_v26  ;;  %383 = vmatprep.mubr.msk.f32.mxu1 %vm183_vm1, %v169_v23  ;;  %v172_v30 = vmax.f32 %v154_v25, 0.0 }
  0xd2   :  { %v377_v28 = vpop.f32.mrf.mxu0  ;;  %384 = vmatmul.mubr.msk.f32.gmra.mxu1 %vm183_vm1, %v170_v24 }
  0xd3   :  { %v171_v29 = vmax.f32 %v149_v27, 0.0  ;;  %v164_v31 = vadd.f32 %v377_v28, %v325_v11 }
  0xd4   :  { %v158_v32 = vpop.f32.mrf.mxu0 }
  0xd5   :  { %v159_v33 = vadd.f32 %v325_v11, %v158_v32  ;;  %386 = vmatprep.mubr.msk.f32.mxu1 %vm183_vm1, %v171_v29  ;;  %v174_v35 = vmax.f32 %v164_v31, 0.0 }
  0xd6   :  { %387 = vmatmul.mubr.msk.f32.gmra.mxu1 %vm183_vm1, %v172_v30 }
  0xd7   :  { %v173_v34 = vmax.f32 %v159_v33, 0.0 }
  0xd9   :  { %389 = vmatprep.mubr.msk.f32.mxu1 %vm183_vm1, %v173_v34 }
  0xda   :  { %390 = vmatmul.mubr.msk.f32.gmra.mxu1 %vm183_vm1, %v174_v35 }
 0x18e   :  { %v382_v37 = vpop.f32.mrf.mxu1 }
 0x18f   :  { %v280_v38 = vadd.f32 %v382_v37, %v334_v36 }
 0x190   :  { %v274_v39 = vpop.f32.mrf.mxu1 }
 0x191   :  { %314 = vst.msk [vmem:[%s514_s5 + $0x8] sm:$0xff] %vm183_vm1, %v280_v38  ;;  %v275_v40 = vadd.f32 %v334_v36, %v274_v39 }
 0x192   :  { %v385_v41 = vpop.f32.mrf.mxu1 }
 0x193   :  { %313 = vst.msk [vmem:[%s514_s5] sm:$0xff] %vm183_vm1, %v275_v40  ;;  %v290_v42 = vadd.f32 %v385_v41, %v334_v36 }
 0x194   :  { %v284_v43 = vpop.f32.mrf.mxu1 }
 0x195   :  { %316 = vst.msk [vmem:[%s514_s5 + $0x18] sm:$0xff] %vm183_vm1, %v290_v42  ;;  %v285_v44 = vadd.f32 %v334_v36, %v284_v43 }
 0x196   :  { %v388_v45 = vpop.f32.mrf.mxu1 }
 0x197   :  { %315 = vst.msk [vmem:[%s514_s5 + $0x10] sm:$0xff] %vm183_vm1, %v285_v44  ;;  %v300_v46 = vadd.f32 %v388_v45, %v334_v36 }
 0x198   :  { %v294_v47 = vpop.f32.mrf.mxu1 }
 0x199   :  { %318 = vst.msk [vmem:[%s514_s5 + $0x28] sm:$0xff] %vm183_vm1, %v300_v46  ;;  %v295_v48 = vadd.f32 %v334_v36, %v294_v47 }
 0x19a   :  { %v391_v49 = vpop.f32.mrf.mxu1 }
 0x19b   :  { %317 = vst.msk [vmem:[%s514_s5 + $0x20] sm:$0xff] %vm183_vm1, %v295_v48  ;;  %v310_v50 = vadd.f32 %v391_v49, %v334_v36 }
 0x19c   :  { %v304_v51 = vpop.f32.mrf.mxu1 }
 0x19d   :  { %320 = vst.msk [vmem:[%s514_s5 + $0x38] sm:$0xff] %vm183_vm1, %v310_v50  ;;  %v305_v52 = vadd.f32 %v334_v36, %v304_v51 }
 0x19f   :  { %319 = vst.msk [vmem:[%s514_s5 + $0x30] sm:$0xff] %vm183_vm1, %v305_v52 }

</bundles_post_ra>
